<compile_context>
chip_gen: v7x
topology: tpu7x:2x2x1
jax: 0.10.0
libtpu: 0.0.40
codegen_flags: <defaults>
</compile_context>

<pallas_src>
import math

import jax
import jax.numpy as jnp
import numpy as np
from jax.experimental import pallas as pl
from jax.experimental.pallas import tpu as pltpu


def adapter_kernel(x_ref, w_ref, b_ref, o_ref):
    """One (batch-tile, spatial-tile) block per grid step.

    x_ref : (Bt, Cin, HWt)   input, spatial flattened on the lane dim
    w_ref : (Cout, Cin)      1x1 conv weight
    b_ref : (Cout, 1)        bias
    o_ref : (Bt, Cout, HWt)  output
    """
    w = w_ref[...]            # (Cout, Cin)   -- hoisted out of the unrolled loop
    bias = b_ref[...]         # (Cout, 1)
    for bb in range(x_ref.shape[0]):          # static unroll over the batch tile
        acc = jnp.dot(w, x_ref[bb],
                      preferred_element_type=jnp.float32)   # (Cout, HWt), MXU
        acc = acc + bias                                     # bias broadcast
        out = jnp.maximum(acc, 0.2 * acc)                    # LeakyReLU(0.2)
        o_ref[bb] = out.astype(o_ref.dtype)


def _choose_tiles(B, Cin, HW, dtype_bytes=4,
                  target_bytes=128 * 1024, hw_tile_max=16384, bt_max=8):
    """Pick (batch_tile, spatial_tile) so per-step DMAs are fat and VMEM bounded."""
    # Spatial tile: whole extent if small; otherwise a 128-multiple cap that keeps
    # the double-buffered f32 footprint ~ 128*Bt*HWt bytes well under 32 MiB.
    hwt = HW if HW <= hw_tile_max else hw_tile_max
    # Batch tile: fold batch until per-step input transfer reaches the target
    # (or the full batch), keeping the in-kernel unroll bounded.
    per_b = max(1, Cin * hwt * dtype_bytes)
    bt = max(1, min(B, -(-target_bytes // per_b)))
    bt = min(bt, bt_max)
    return bt, hwt


def adapter_block(x_nchw, weight, bias):
    """AdapterBlock forward.

    x_nchw: (B, 3, H, W) float32
    weight: (Cout, 3, 1, 1)  PyTorch OIHW conv weight
    bias  : (Cout,)
    returns (B, Cout, H, W)
    """
    B, Cin, H, W = x_nchw.shape
    Cout = weight.shape[0]
    HW = H * W

    # Free (contiguous) reshapes only -- no transposes, no padding.
    x_flat = x_nchw.reshape(B, Cin, HW)
    w2d = weight.reshape(Cout, Cin)
    b2d = bias.reshape(Cout, 1)

    bt, hwt = _choose_tiles(B, Cin, HW, dtype_bytes=x_nchw.dtype.itemsize)
    grid = (pl.cdiv(B, bt), pl.cdiv(HW, hwt))

    out_flat = pl.pallas_call(
        adapter_kernel,
        out_shape=jax.ShapeDtypeStruct((B, Cout, HW), x_nchw.dtype),
        grid=grid,
        in_specs=[
            pl.BlockSpec((bt, Cin, hwt), lambda i, j: (i, 0, j)),
            pl.BlockSpec((Cout, Cin), lambda i, j: (0, 0)),
            pl.BlockSpec((Cout, 1), lambda i, j: (0, 0)),
        ],
        out_specs=pl.BlockSpec((bt, Cout, hwt), lambda i, j: (i, 0, j)),
        compiler_params=pltpu.CompilerParams(
            dimension_semantics=("parallel", "parallel")),
    )(x_flat, w2d, b2d)

    return out_flat.reshape(B, Cout, H, W)


def adapter_block_ref(x_nchw, weight, bias):
    """Pure-JAX reference reproducing the PyTorch forward (NCHW)."""
    out = jax.lax.conv_general_dilated(
        x_nchw, weight, window_strides=(1, 1), padding="VALID",
        dimension_numbers=("NCHW", "OIHW", "NCHW"))
    out = out + bias[None, :, None, None]
    return jnp.where(out >= 0.0, out, 0.2 * out)


if __name__ == "__main__":
    B, Cin, H, W = 2, 3, 16, 16   # Conv2d(3, ...) fixes Cin=3
    Cout = 8

    key = jax.random.PRNGKey(0)
    kx, kw, kb = jax.random.split(key, 3)
    x = jax.random.normal(kx, (B, Cin, H, W), dtype=jnp.float32)

    # Deterministic Conv2d-style init: U(-1/sqrt(fan_in), 1/sqrt(fan_in)),
    # fan_in = Cin * 1 * 1.
    bound = 1.0 / math.sqrt(Cin * 1 * 1)
    weight = jax.random.uniform(kw, (Cout, Cin, 1, 1), jnp.float32, -bound, bound)
    bias = jax.random.uniform(kb, (Cout,), jnp.float32, -bound, bound)

    out = adapter_block(x, weight, bias)
    out = jax.block_until_ready(out)

    ref = jax.block_until_ready(adapter_block_ref(x, weight, bias))
    np.testing.assert_allclose(np.asarray(out), np.asarray(ref), rtol=1e-5, atol=1e-6)

    print("KERNEL_OK")
</pallas_src>

<mosaic_0001>
module attributes {stable_mosaic.version = 11 : i64} {
  func.func @adapter_kernel(%arg0: i32, %arg1: i32, %arg2: memref<2x3x256xf32, #tpu.memory_space<vmem>>, %arg3: memref<8x3xf32, #tpu.memory_space<vmem>>, %arg4: memref<8x1xf32, #tpu.memory_space<vmem>>, %arg5: memref<2x8x256xf32, #tpu.memory_space<vmem>>) attributes {dimension_semantics = [#tpu.dimension_semantics<parallel>, #tpu.dimension_semantics<parallel>], iteration_bounds = array<i64: 1, 1>, scalar_prefetch = 0 : i64, scratch_operands = 0 : i64, tpu.core_type = #tpu.core_type<tc>, window_params = [{transform_indices = @transform_0, window_bounds = array<i64: 2, 3, 256>}, {pipeline_mode = #tpu.pipeline_mode<synchronous>, transform_indices = @transform_1, window_bounds = array<i64: 8, 3>}, {pipeline_mode = #tpu.pipeline_mode<synchronous>, transform_indices = @transform_2, window_bounds = array<i64: 8, 1>}, {transform_indices = @transform_3, window_bounds = array<i64: 2, 8, 256>}]} {
    %c0 = arith.constant 0 : index
    %c0_0 = arith.constant 0 : index
    %0 = vector.load %arg3[%c0, %c0_0] : memref<8x3xf32, #tpu.memory_space<vmem>>, vector<8x3xf32>
    %c0_1 = arith.constant 0 : index
    %c0_2 = arith.constant 0 : index
    %1 = vector.load %arg4[%c0_1, %c0_2] : memref<8x1xf32, #tpu.memory_space<vmem>>, vector<8x1xf32>
    %c0_3 = arith.constant 0 : index
    %c0_4 = arith.constant 0 : index
    %c0_5 = arith.constant 0 : index
    %2 = vector.load %arg2[%c0_3, %c0_4, %c0_5] : memref<2x3x256xf32, #tpu.memory_space<vmem>>, vector<1x3x256xf32>
    %3 = vector.shape_cast %2 : vector<1x3x256xf32> to vector<3x256xf32>
    %cst = arith.constant dense<0.000000e+00> : vector<8x256xf32>
    %4 = tpu.matmul %0, %3, %cst {dimension_numbers = #tpu.dot_dimension_numbers<[1], [0], [0], [1], [0, 0, 1, 1], [], []>} : vector<8x3xf32>, vector<3x256xf32>, vector<8x256xf32> -> vector<8x256xf32>
    %5 = vector.broadcast %1 : vector<8x1xf32> to vector<8x256xf32>
    %6 = arith.addf %4, %5 : vector<8x256xf32>
    %cst_6 = arith.constant 2.000000e-01 : f32
    %7 = vector.broadcast %cst_6 : f32 to vector<8x256xf32>
    %8 = arith.mulf %7, %6 : vector<8x256xf32>
    %9 = arith.maximumf %6, %8 : vector<8x256xf32>
    %c0_7 = arith.constant 0 : index
    %c0_8 = arith.constant 0 : index
    %c0_9 = arith.constant 0 : index
    %10 = vector.load %arg5[%c0_7, %c0_8, %c0_9] : memref<2x8x256xf32, #tpu.memory_space<vmem>>, vector<1x8x256xf32>
    %11 = vector.shape_cast %10 : vector<1x8x256xf32> to vector<8x256xf32>
    %12 = vector.shape_cast %9 : vector<8x256xf32> to vector<1x8x256xf32>
    tpu.vector_store %arg5[%c0_7, %c0_8, %c0_9], %12 {strides = array<i32>} : memref<2x8x256xf32, #tpu.memory_space<vmem>>, vector<1x8x256xf32>,
    %c1 = arith.constant 1 : index
    %c0_10 = arith.constant 0 : index
    %c0_11 = arith.constant 0 : index
    %13 = vector.load %arg2[%c1, %c0_10, %c0_11] : memref<2x3x256xf32, #tpu.memory_space<vmem>>, vector<1x3x256xf32>
    %14 = vector.shape_cast %13 : vector<1x3x256xf32> to vector<3x256xf32>
    %cst_12 = arith.constant dense<0.000000e+00> : vector<8x256xf32>
    %15 = tpu.matmul %0, %14, %cst_12 {dimension_numbers = #tpu.dot_dimension_numbers<[1], [0], [0], [1], [0, 0, 1, 1], [], []>} : vector<8x3xf32>, vector<3x256xf32>, vector<8x256xf32> -> vector<8x256xf32>
    %16 = vector.broadcast %1 : vector<8x1xf32> to vector<8x256xf32>
    %17 = arith.addf %15, %16 : vector<8x256xf32>
    %cst_13 = arith.constant 2.000000e-01 : f32
    %18 = vector.broadcast %cst_13 : f32 to vector<8x256xf32>
    %19 = arith.mulf %18, %17 : vector<8x256xf32>
    %20 = arith.maximumf %17, %19 : vector<8x256xf32>
    %c1_14 = arith.constant 1 : index
    %c0_15 = arith.constant 0 : index
    %c0_16 = arith.constant 0 : index
    %21 = vector.load %arg5[%c1_14, %c0_15, %c0_16] : memref<2x8x256xf32, #tpu.memory_space<vmem>>, vector<1x8x256xf32>
    %22 = vector.shape_cast %21 : vector<1x8x256xf32> to vector<8x256xf32>
    %23 = vector.shape_cast %20 : vector<8x256xf32> to vector<1x8x256xf32>
    tpu.vector_store %arg5[%c1_14, %c0_15, %c0_16], %23 {strides = array<i32>} : memref<2x8x256xf32, #tpu.memory_space<vmem>>, vector<1x8x256xf32>,
    return
  }
  func.func @transform_0(%arg0: i32, %arg1: i32) -> (i32, i32, i32) {
    %c0_i32 = arith.constant 0 : i32
    %c0_i32_0 = arith.constant 0 : i32
    return %arg0, %c0_i32, %arg1 : i32, i32, i32
  }
  func.func @transform_1(%arg0: i32, %arg1: i32) -> (i32, i32) {
    %c0_i32 = arith.constant 0 : i32
    %c0_i32_0 = arith.constant 0 : i32
    %c0_i32_1 = arith.constant 0 : i32
    return %c0_i32, %c0_i32_0 : i32, i32
  }
  func.func @transform_2(%arg0: i32, %arg1: i32) -> (i32, i32) {
    %c0_i32 = arith.constant 0 : i32
    %c0_i32_0 = arith.constant 0 : i32
    %c0_i32_1 = arith.constant 0 : i32
    return %c0_i32, %c0_i32_0 : i32, i32
  }
  func.func @transform_3(%arg0: i32, %arg1: i32) -> (i32, i32, i32) {
    %c0_i32 = arith.constant 0 : i32
    %c0_i32_0 = arith.constant 0 : i32
    return %arg0, %c0_i32, %arg1 : i32, i32, i32
  }
}

</mosaic_0001>

<bundles_post_ra>
// kernel: tpu_custom_call.1
= control target key start
LH: loop header
LB: loop body
LE: loop exit
PB: predicated region body
PF: predicated region fallthrough
CT: control target
= control target key end

     0   :  { %vm29_vm0 = vcmask 1042432   ;;  %v252_v4 = vmov 0.0   ;;  %s305_s0 = inlined_call_operand.vmem [shape: f32[2,3,256], index: 0, kind: input, shape index: {}]   ;;  %s306_s1 = inlined_call_operand.vmem [shape: f32[8,3], index: 1, kind: input, shape index: {}]   ;;  %s307_s2 = inlined_call_operand.vmem [shape: f32[8,1], index: 2, kind: input, shape index: {}]   ;;  %s308_s3 = inlined_call_operand.hbm [shape: f32[2,8,256], index: 3, kind: output, shape index: {}]  }
   0x1   :  { %v17_v0 = vld [vmem:[%s305_s0] sm:$0x77]  ;;  %v216_v1 = vld [vmem:[%s305_s0 + $0x8] sm:$0x77]  ;;  %98 = vmatprep.mubr.f32.mxu0 %v252_v4  ;;  %183 = vmatprep.mubr.f32.mxu1 %v252_v4 }
   0x2   :  { %v24_v2 = vcombine.high %v17_v0, %v17_v0  ;;  %v114_v3 = vcombine.high %v216_v1, %v216_v1 }
   0x3   :  { %8 = vsyncpa [#allocation3], 0  ;;  %v15_v5 = vld [vmem:[%s306_s1] sm:$0xff]  ;;  %vm25_vm1 = vcmask 23552   ;;  %v253_v6 = vmov 0   ;;  %s254_s0 = smov [#allocation2]  }
   0x4   :  { %225 = vset.pattern.permute.xlu0 %v253_v6  ;;  %213 = vmatprep.subr.msk.mxu0 %vm29_vm0, %v24_v2  ;;  %v16_v7 = vld [vmem:[%s307_s2] sm:$0xff]  ;;  %s202_s1 = sshll.u32 %s254_s0, 4  ;;  %s203_s1 = int_to_ptr.vmem [resolvable:$true] %s202_s1 }
   0x5   :  { %217 = vmatprep.subr.msk.mxu1 %vm29_vm0, %v114_v3  ;;  %214 = vmatpush1.msk.msra.mxu0 %vm29_vm0, %v17_v0  ;;  %s228_s2 = scalar_lea.vmem %s203_s1, 512  ;;  %p233_p1 = scmp.lt.s32.totalorder %s203_s1, %s203_s1 }
   0x6   :  { %218 = vmatpush1.msk.msra.mxu1 %vm29_vm0, %v216_v1  ;;  %215 = vmatmul.mubr.msk.f32.vlgmr.msra.gmra.mrb[0].mxu0 %vm25_vm1, %v15_v5  ;;  %p229_p0 = scmp.ne.s32.totalorder %s203_s1, %s228_s2  ;;  %p234_p2 = scmp.lt.s32.totalorder %s228_s2, %s228_s2 }
   0x7   :  { %219 = vmatmul.mubr.msk.f32.vlgmr.msra.gmra.mrb[0].mxu1 %vm25_vm1, %v15_v5  ;;  %20 = vperm.xlu0 %225, %v16_v7  }
   0x8   :  { %p235_p3 = por %p234_p2, %p233_p1 }
   0xa   :  { %p236_p4 = pnand %p235_p3, %p229_p0 }
  0x86   :  { %v21_v8 = vpop.permute.xlu0 %20 }
  0xd9   :  { %v100_v9 = vpop.f32.mrb[0].mxu0 }
  0xda   :  { %v185_v10 = vpop.f32.mrb[0].mxu1  ;;  %v101_v11 = vadd.f32 %v100_v9, %v21_v8  ;;  %v102_v13 = vpop.f32.mrb[1].mxu0 }
  0xdb   :  { %v186_v12 = vadd.f32 %v185_v10, %v21_v8  ;;  %v187_v14 = vpop.f32.mrb[1].mxu1  ;;  %v103_v15 = vadd.f32 %v102_v13, %v21_v8 }
  0xdc   :  { %v188_v16 = vadd.f32 %v187_v14, %v21_v8  ;;  %v105_v17 = vmul.f32 0.2, %v101_v11 }
  0xdd   :  { %v190_v18 = vmul.f32 0.2, %v186_v12  ;;  %v106_v19 = vmul.f32 0.2, %v103_v15 }
  0xde   :  { %v191_v20 = vmul.f32 0.2, %v188_v16  ;;  %v107_v21 = vmax.f32 %v101_v11, %v105_v17 }
  0xdf   :  { %v192_v22 = vmax.f32 %v186_v12, %v190_v18  ;;  %v108_v23 = vmax.f32 %v103_v15, %v106_v19 }
  0xe0   :  { %v193_v24 = vmax.f32 %v188_v16, %v191_v20  ;;  %109 = vst [vmem:[#allocation2] sm:$0xff] %v107_v21 }
  0xe1   :  { %195 = vst [vmem:[#allocation2 + $0x10] sm:$0xff] %v192_v22  ;;  %110 = vst [vmem:[#allocation2 + $0x8] sm:$0xff] %v108_v23 }
  0xe2   :  { %196 = vst [vmem:[#allocation2 + $0x18] sm:$0xff] %v193_v24 }
  0xe3   :  { %239 = shalt.err (!%p236_p4)
}
  0xe4   :  { %s240_s22 = scalar_lea.hbm %s308_s3, 512 }
  0xe5   :  { %p241_p5 = scmp.ne.s32.totalorder %s308_s3, %s240_s22  ;;  %p244_p6 = scmp.lt.u32.totalorder %s240_s22, %s308_s3 }
  0xe7   :  { %p246_p7 = pnand %p244_p6, %p241_p5 }
  0xe9   :  { %249 = shalt.err (!%p246_p7)
}
  0xea   :  { %s255_s27 = smov 256   ;;  %s256_s28 = smov 16  }
  0xeb   :  { %208 = dma.vmem_to_hbm [thread:$0]  %s203_s1, 512, %s308_s3, [#allocation3], %s255_s27, %s255_s27, %s256_s28  }
  0xec   :  { %250 = dma.done.wait [#allocation3], 512  }
  0xed   :  { %251 = vsyncadd [#allocation3], 4294966784 }
  0xee   :  { %212 = vsyncpa [#allocation3], 1 }

</bundles_post_ra>
